<compile_context>
chip_gen: v7x
topology: tpu7x:2x2x1
jax: 0.10.0
libtpu: 0.0.40
codegen_flags: <defaults>
</compile_context>

<pallas_src>
import functools

import jax
import jax.numpy as jnp
from jax.experimental import pallas as pl
from jax.experimental.pallas import tpu as pltpu


def _fermi_dirac_kernel(dist_ref, out_ref, *, inv_t, r):
    # Compute in f32: free when the input is f32, required on v5e (no bf16
    # VPU/EUP).  TODO(synk): for bf16 inputs on v6e/v7x this cast could be
    # dropped to stay packed; kept f32 here so one kernel is safe on all gens.
    x = dist_ref[...].astype(jnp.float32)
    # probs = 1 / (exp((x - r) / t) + 1), with 1/t precomputed at trace time.
    z = jnp.exp((x - r) * inv_t) + 1.0
    out_ref[...] = pl.reciprocal(z, approx=True).astype(out_ref.dtype)


def fermi_dirac_decoder(dist, r, t, *, max_block_bytes=8 << 20):
    """probs = 1/(exp((dist - r)/t) + 1), elementwise.

    Accepts any rank; internally flattens to 2-D [M, N] (N = last dim) and
    streams full-width row slabs through VMEM.
    """
    orig_shape = dist.shape
    x2d = dist.reshape(1, -1) if dist.ndim == 1 else dist.reshape(-1, orig_shape[-1])
    M, N = x2d.shape

    # Rows per block: the largest full-row slab under max_block_bytes,
    # rounded to the sublane multiple of 8, but keep >= 2 grid steps when the
    # row count allows so the parallel axis can shard across v7x's 2 TCs.
    row_bytes = N * x2d.dtype.itemsize
    tm_cap = max(1, max_block_bytes // max(row_bytes, 1))
    if tm_cap >= M:
        if M >= 16:
            tm = (((M + 1) // 2) + 7) // 8 * 8    # ~half the rows, 8-aligned
        else:
            tm = M                                # tiny input: one full block
    else:
        tm = max(8, (tm_cap // 8) * 8)
    grid_m = pl.cdiv(M, tm)                       # partial last block is masked

    kernel = functools.partial(
        _fermi_dirac_kernel, inv_t=1.0 / float(t), r=float(r))

    out2d = pl.pallas_call(
        kernel,
        out_shape=jax.ShapeDtypeStruct((M, N), x2d.dtype),
        grid=(grid_m,),
        in_specs=[pl.BlockSpec((tm, N), lambda i: (i, 0))],
        out_specs=pl.BlockSpec((tm, N), lambda i: (i, 0)),
        compiler_params=pltpu.CompilerParams(
            dimension_semantics=("parallel",),
            # 2x(in) + 2x(out) blocks <= ~32 MiB; 48 MiB scoped limit leaves
            # headroom yet stays under v7x's 64 MiB physical VMEM.
            vmem_limit_bytes=48 << 20,
        ),
    )(x2d)
    return out2d.reshape(orig_shape)


if __name__ == "__main__":
    # Hyperparameters mirroring FermiDiracDecoder(r, t).
    r = 2.0
    t = 1.0

    key = jax.random.PRNGKey(0)
    # Small 2-D distance matrix (64 x 256 pairwise distances).
    dist = jax.random.uniform(key, (64, 256), dtype=jnp.float32,
                              minval=0.0, maxval=5.0)

    probs = fermi_dirac_decoder(dist, r, t)
    probs = jax.block_until_ready(probs)

    # Reference check against plain JAX.  approx=True reciprocal uses the EUP
    # vrcp -> expect ~1e-3/1e-4 relative error, so tolerance is loosened.
    ref = 1.0 / (jnp.exp((dist - r) / t) + 1.0)
    assert probs.shape == dist.shape
    assert jnp.allclose(probs, ref, atol=1e-2, rtol=1e-2), "mismatch vs reference"

    print("KERNEL_OK")
</pallas_src>

<mosaic_0001>
module attributes {stable_mosaic.version = 11 : i64} {
  func.func @_fermi_dirac_kernel(%arg0: i32, %arg1: memref<32x256xf32, #tpu.memory_space<vmem>>, %arg2: memref<32x256xf32, #tpu.memory_space<vmem>>) attributes {dimension_semantics = [#tpu.dimension_semantics<parallel>], iteration_bounds = array<i64: 2>, scalar_prefetch = 0 : i64, scratch_operands = 0 : i64, tpu.core_type = #tpu.core_type<tc>, window_params = [{transform_indices = @transform_0, window_bounds = array<i64: 32, 256>}, {transform_indices = @transform_1, window_bounds = array<i64: 32, 256>}]} {
    %c0 = arith.constant 0 : index
    %c0_0 = arith.constant 0 : index
    %0 = vector.load %arg1[%c0, %c0_0] : memref<32x256xf32, #tpu.memory_space<vmem>>, vector<32x256xf32>
    %cst = arith.constant 2.000000e+00 : f32
    %1 = vector.broadcast %cst : f32 to vector<32x256xf32>
    %2 = arith.subf %0, %1 : vector<32x256xf32>
    %cst_1 = arith.constant 1.000000e+00 : f32
    %3 = vector.broadcast %cst_1 : f32 to vector<32x256xf32>
    %4 = arith.mulf %2, %3 : vector<32x256xf32>
    %5 = math.exp %4 : vector<32x256xf32>
    %cst_2 = arith.constant 1.000000e+00 : f32
    %6 = vector.broadcast %cst_2 : f32 to vector<32x256xf32>
    %7 = arith.addf %5, %6 : vector<32x256xf32>
    %8 = tpu.reciprocal %7 {approx = true} : vector<32x256xf32> -> vector<32x256xf32>
    %c0_3 = arith.constant 0 : index
    %c0_4 = arith.constant 0 : index
    %9 = vector.load %arg2[%c0_3, %c0_4] : memref<32x256xf32, #tpu.memory_space<vmem>>, vector<32x256xf32>
    tpu.vector_store %arg2[%c0_3, %c0_4], %8 {strides = array<i32>} : memref<32x256xf32, #tpu.memory_space<vmem>>, vector<32x256xf32>,
    return
  }
  func.func @transform_0(%arg0: i32) -> (i32, i32) {
    %c0_i32 = arith.constant 0 : i32
    %c0_i32_0 = arith.constant 0 : i32
    return %arg0, %c0_i32 : i32, i32
  }
  func.func @transform_1(%arg0: i32) -> (i32, i32) {
    %c0_i32 = arith.constant 0 : i32
    %c0_i32_0 = arith.constant 0 : i32
    return %arg0, %c0_i32 : i32, i32
  }
}

</mosaic_0001>

<bundles_post_ra>
// kernel: tpu_custom_call.1
= control target key start
LH: loop header
LB: loop body
LE: loop exit
PB: predicated region body
PF: predicated region fallthrough
CT: control target
= control target key end

     0   :  { %6 = vsyncpa [#allocation3], 0  ;;  %s672_s0 = inlined_call_operand.hbm [shape: f32[64,256], index: 0, kind: input, shape index: {}]   ;;  %s673_s1 = inlined_call_operand.hbm [shape: f32[64,256], index: 1, kind: output, shape index: {}]  }
   0x1   :  { %8 = vsyncpa [#allocation3 + $0x1], 0 }
   0x2   :  { %9 = vsyncpa [#allocation4], 0 }
   0x3   :  { %11 = vsyncpa [#allocation4 + $0x1], 0  ;;  %s506_s6 = smov 0   ;;  %s508_s7 = smov 0  }
   0x4   :  { %s510_s8 = smov 0   ;;  %s512_s9 = smov 0  }
   0x5 LB: > { %s527_s10 = sadd.s32 4294967295, %s488_s9   ;;  %s282_s11 = sadd.s32 4294967294, %s488_s9   ;;  %s488_s9 = sphi %s512_s9, %s686_s9   ;;  %s484_s8 = sphi %s510_s8, %s685_s8   ;;  %s480_s7 = sphi %s508_s7, %s684_s7   ;;  %s476_s6 = sphi %s506_s6, %s683_s6  }
   0x6   : > { %s531_s12 = sadd.s32 1, %s488_s9   ;;  %s24_s13 = sadd.s32 1, %s484_s8 }
   0x7   : > { %s21_s14 = ssub.s32 %s488_s9, %s531_s12  ;;  %p31_p0 = scmp.ne.s32.totalorder %s484_s8, %s480_s7 }
   0x8   : > { %p22_p1 = scmp.eq.s32.totalorder %s21_s14, 0  ;;  %p32_p2 = scmp.eq.s32.totalorder %s488_s9, 0 }
   0x9   : > { %p37_p3 = scmp.ne.s32.totalorder %s480_s7, %s476_s6  ;;  %p38_p4 = scmp.eq.s32.totalorder %s527_s10, 0 }
   0xa   : > { %s543_s15 = scalar_select %p22_p1, %s484_s8, %s24_s13  }
   0xb   : > { %p545_p5 = por %p32_p2, %p31_p0  ;;  %p549_p6 = por %p38_p4, %p37_p3 }
   0xc   : > { %p61_p7 = scmp.eq.s32.totalorder %s527_s10, 1  ;;  %p67_p8 = scmp.eq.s32.totalorder %s282_s11, 1 }
   0xd   : > { %p322_p10 = scmp.lt.s32.totalorder %s488_s9, 2  ;;  %s87_s20 = sand.u32 1, %s484_s8  }
   0xe   : > { %p556_p11 = por %p61_p7, %p31_p0  ;;  %p560_p12 = por %p67_p8, %p37_p3 }
   0xf   : > { %s307_s21 = sshll.u32 %s488_s9, 10  ;;  %s285_s22 = sshll.u32 %s87_s20, 6 }
  0x10   : > { %s677_s18 = scalar_select %p556_p11, 1, 0 }
  0x11   : > { %s678_s19 = scalar_select %p560_p12, 1, 0 }
  0x12   : > { %s569_s25 = scalar_lea.hbm %s672_s0, %s307_s21  ;;  %s91_s26 = scalar_lea.vmem [#allocation2], %s285_s22 }
  0x13   : > { %s99_s27 = sshll.u32 %s91_s26, 4  ;;  %p573_p13 = pnand %p322_p10, %p545_p5  ;;  %s577_s27 = int_to_ptr.vmem [resolvable:$true] %s99_s27 }
  0x14   : > { %s579_s29 = scalar_lea.sflag [#allocation3], %s87_s20  ;;  %s392_s30 = scalar_lea.hbm %s569_s25, 1024 }
  0x15   : > { %p393_p0 = scmp.ne.s32.totalorder %s569_s25, %s392_s30  ;;  %p394_p1 = pneg %p573_p13 }
  0x16   : > { %s397_s4 = scalar_lea.hbm %s672_s0, 2048  ;;  %p398_p4 = scmp.lt.u32.totalorder %s569_s25, %s672_s0 }
  0x17   : > { %p395_p2 = pnand %p394_p1, %p393_p0  ;;  %p399_p5 = scmp.lt.u32.totalorder %s397_s4, %s392_s30 }
  0x18   : > { %p401_p8 = scmp.lt.u32.totalorder %s392_s30, %s569_s25 }
  0x19   : > { %p396_p3 = pneg %p395_p2  ;;  %p400_p7 = por %p399_p5, %p398_p4 }
  0x1b   : > { %p402_p10 = por %p401_p8, %p400_p7 }
  0x1d   : > { %p403_p9 = pnand %p402_p10, %p396_p3 }
  0x1f   : > { %406 = shalt.err (!%p403_p9)
}
  0x20   : > { %s407_s13 = scalar_lea.vmem %s577_s27, 1024  ;;  %s490_s14 = smov [#allocation2]  }
  0x21   : > { %p408_p0 = scmp.ne.s32.totalorder %s577_s27, %s407_s13  ;;  %s412_s16 = sshll.u32 %s490_s14, 4  ;;  %s413_s16 = int_to_ptr.vmem [resolvable:$false] %s412_s16 }
  0x22   : > { %s414_s20 = scalar_lea.vmem %s413_s16, 2048  ;;  %p415_p11 = scmp.lt.s32.totalorder %s577_s27, %s413_s16 }
  0x23   : > { %p410_p2 = pnand %p408_p0, %p394_p1  ;;  %p416_p4 = scmp.lt.s32.totalorder %s414_s20, %s407_s13 }
  0x25   : > { %p411_p12 = pneg %p410_p2  ;;  %p417_p5 = por %p416_p4, %p415_p11 }
  0x27   : > { %p418_p7 = pnand %p417_p5, %p411_p12 }
  0x29   : > { %421 = shalt.err (!%p418_p7)
}
  0x2a   : > { %s491_s21 = smov 256   ;;  %s492_s22 = smov 16  }
  0x2b   : > { %317 = dma.hbm_to_vmem [thread:$0]  (!%p573_p13), %s569_s25, 1024, %s577_s27, %s579_s29, %s491_s21, %s491_s21, %s492_s22  }
  0x2c   : > { %p289_p9 = scmp.ge.s32.totalorder %s488_s9, 1  ;;  %p107_p1 = scmp.lt.s32.totalorder %s488_s9, 3 }
  0x2e   : > { %p108_p3 = pnand %p289_p9, %p107_p1 }
  0x2f   : > { %s610_s23 = sand.u32 (!%p108_p3), 1, %s480_s7  }
  0x30   : > { %111 = sbr.rel (%p108_p3) target bundleno = 107 (0x6b), region = 24  ;;  %s290_s24 = sshll.u32 (!%p108_p3), %s610_s23, 6 }
  0x31   : > { %s114_s26 = scalar_lea.sflag (!%p108_p3), [#allocation3], %s610_s23  ;;  %s117_s30 = scalar_lea.vmem (!%p108_p3), [#allocation2], %s290_s24 }
  0x37   : > { %467 = dma.done.wait (%p549_p6), %s114_s26, 1024  }
  0x38   : > { %469 = vsyncadd (%p549_p6), %s114_s26, 4294966272  ;;  %v138_v0 = vld [vmem:[%s117_s30] sm:$0xff]  ;;  %v139_v1 = vld [vmem:[%s117_s30 + $0x8] sm:$0xff]  ;;  %s135_s17 = scalar_lea.vmem [#allocation5], %s290_s24  ;;  %s309_s27 = sshll.u32 %s527_s10, 10 }
  0x39   : > { %v140_v2 = vld [vmem:[%s117_s30 + $0x10] sm:$0xff]  ;;  %v292_v3 = vadd.f32 -2.0, %v138_v0  ;;  %v293_v4 = vadd.f32 -2.0, %v139_v1  ;;  %v141_v6 = vld [vmem:[%s117_s30 + $0x18] sm:$0xff]  ;;  %v142_v7 = vld [vmem:[%s117_s30 + $0x20] sm:$0xff]  ;;  %s209_s25 = sshll.u32 %s135_s17, 4  ;;  %s628_s2 = scalar_lea.hbm %s673_s1, %s309_s27  ;;  %s623_s25 = int_to_ptr.vmem [resolvable:$true] %s209_s25 }
  0x3a   : > { %v294_v5 = vadd.f32 -2.0, %v140_v2  ;;  %v143_v8 = vld [vmem:[%s117_s30 + $0x28] sm:$0xff]  ;;  %v295_v9 = vadd.f32 -2.0, %v141_v6  ;;  %v296_v10 = vadd.f32 -2.0, %v142_v7  ;;  %v144_v12 = vld [vmem:[%s117_s30 + $0x30] sm:$0xff]  ;;  %v145_v13 = vld [vmem:[%s117_s30 + $0x38] sm:$0xff] }
  0x3b   : > { %v297_v11 = vadd.f32 -2.0, %v143_v8  ;;  %v154_v14 = vmul.f32 1.442695, %v292_v3  ;;  %v156_v15 = vmul.f32 1.442695, %v293_v4  ;;  %v298_v19 = vadd.f32 -2.0, %v144_v12 }
  0x3c   : > { %v158_v16 = vmul.f32 1.442695, %v294_v5  ;;  %v160_v17 = vmul.f32 1.442695, %v295_v9  ;;  %v162_v18 = vmul.f32 1.442695, %v296_v10 }
  0x3d   : > { %360 = vpow2.f32 %v154_v14  ;;  %v299_v20 = vadd.f32 -2.0, %v145_v13  ;;  %v164_v21 = vmul.f32 1.442695, %v297_v11  ;;  %v166_v22 = vmul.f32 1.442695, %v298_v19  ;;  %s195_s10 = scalar_lea.sflag [#allocation4], %s610_s23 }
  0x3e   : > { %362 = vpow2.f32 %v156_v15  ;;  %s422_s3 = scalar_lea.vmem %s623_s25, 1024  ;;  %p680_p11 = scmp.ne.s32.totalorder %s677_s18, 0 }
  0x3f   : > { %364 = vpow2.f32 %v158_v16  ;;  %v168_v23 = vmul.f32 1.442695, %v299_v20  ;;  %p423_p6 = scmp.ne.s32.totalorder %s623_s25, %s422_s3  ;;  %s493_s4 = smov [#allocation5]  }
  0x40   : > { %366 = vpow2.f32 %v160_v17  ;;  %s426_s5 = sshll.u32 %s493_s4, 4  ;;  %s427_s5 = int_to_ptr.vmem [resolvable:$false] %s426_s5 }
  0x41   : > { %368 = vpow2.f32 %v162_v18  ;;  %p424_p12 = pnand %p423_p6, %p680_p11  ;;  %s428_s11 = scalar_lea.vmem %s427_s5, 2048 }
  0x42   : > { %370 = vpow2.f32 %v164_v21  ;;  %p429_p8 = scmp.lt.s32.totalorder %s623_s25, %s427_s5  ;;  %p430_p10 = scmp.lt.s32.totalorder %s428_s11, %s422_s3 }
  0x43   : > { %372 = vpow2.f32 %v166_v22  ;;  %p425_p13 = pneg %p424_p12 }
  0x44   : > { %374 = vpow2.f32 %v168_v23  ;;  %p431_p0 = por %p430_p10, %p429_p8 }
  0x46   : > { %p432_p2 = pnand %p431_p0, %p425_p13 }
  0x47   : > { %v361_v24 = vpop.eup %360 }
  0x48   : > { %v363_v25 = vpop.eup %362  ;;  %v170_v26 = vadd.f32 1.0, %v361_v24 }
  0x49   : > { %v365_v27 = vpop.eup %364  ;;  %v171_v28 = vadd.f32 1.0, %v363_v25 }
  0x4a   : > { %v367_v29 = vpop.eup %366  ;;  %376 = vrcp.f32 %v170_v26  ;;  %v172_v30 = vadd.f32 1.0, %v365_v27 }
  0x4b   : > { %v369_v31 = vpop.eup %368  ;;  %378 = vrcp.f32 %v171_v28  ;;  %v173_v32 = vadd.f32 1.0, %v367_v29 }
  0x4c   : > { %v371_v33 = vpop.eup %370  ;;  %380 = vrcp.f32 %v172_v30  ;;  %v174_v34 = vadd.f32 1.0, %v369_v31 }
  0x4d   : > { %v373_v35 = vpop.eup %372  ;;  %382 = vrcp.f32 %v173_v32  ;;  %v175_v36 = vadd.f32 1.0, %v371_v33 }
  0x4e   : > { %v375_v37 = vpop.eup %374  ;;  %384 = vrcp.f32 %v174_v34  ;;  %v176_v38 = vadd.f32 1.0, %v373_v35 }
  0x4f   : > { %386 = vrcp.f32 %v175_v36  ;;  %v177_v39 = vadd.f32 1.0, %v375_v37 }
  0x50   : > { %388 = vrcp.f32 %v176_v38 }
  0x51   : > { %390 = vrcp.f32 %v177_v39 }
  0x54   : > { %v377_v40 = vpop.eup %376 }
  0x55   : > { %v379_v41 = vpop.eup %378  ;;  %186 = vst [vmem:[%s135_s17] sm:$0xff] %v377_v40 }
  0x56   : > { %v381_v42 = vpop.eup %380  ;;  %187 = vst [vmem:[%s135_s17 + $0x8] sm:$0xff] %v379_v41 }
  0x57   : > { %v383_v43 = vpop.eup %382  ;;  %188 = vst [vmem:[%s135_s17 + $0x10] sm:$0xff] %v381_v42 }
  0x58   : > { %v385_v44 = vpop.eup %384  ;;  %189 = vst [vmem:[%s135_s17 + $0x18] sm:$0xff] %v383_v43 }
  0x59   : > { %v387_v45 = vpop.eup %386  ;;  %190 = vst [vmem:[%s135_s17 + $0x20] sm:$0xff] %v385_v44 }
  0x5a   : > { %v389_v46 = vpop.eup %388  ;;  %191 = vst [vmem:[%s135_s17 + $0x28] sm:$0xff] %v387_v45 }
  0x5b   : > { %v391_v47 = vpop.eup %390  ;;  %192 = vst [vmem:[%s135_s17 + $0x30] sm:$0xff] %v389_v46 }
  0x5c   : > { %193 = vst [vmem:[%s135_s17 + $0x38] sm:$0xff] %v391_v47 }
  0x5d   : > { %435 = shalt.err (!%p432_p2)
}
  0x5e   : > { %s436_s13 = scalar_lea.hbm %s628_s2, 1024  ;;  %s440_s20 = scalar_lea.hbm %s673_s1, 2048 }
  0x5f   : > { %p437_p4 = scmp.ne.s32.totalorder %s628_s2, %s436_s13  ;;  %p441_p9 = scmp.lt.u32.totalorder %s628_s2, %s673_s1 }
  0x60   : > { %p442_p1 = scmp.lt.u32.totalorder %s440_s20, %s436_s13  ;;  %p444_p6 = scmp.lt.u32.totalorder %s436_s13, %s628_s2 }
  0x61   : > { %p438_p5 = pnand %p437_p4, %p680_p11 }
  0x62   : > { %p443_p3 = por %p442_p1, %p441_p9 }
  0x63   : > { %p439_p7 = pneg %p438_p5 }
  0x64   : > { %p445_p12 = por %p444_p6, %p443_p3 }
  0x66   : > { %p446_p13 = pnand %p445_p12, %p439_p7 }
  0x68   : > { %449 = shalt.err (!%p446_p13)
}
  0x69   : > { %s494_s24 = smov 256   ;;  %s495_s26 = smov 16  }
  0x6a   : > { %312 = dma.vmem_to_hbm [thread:$0]  (%p680_p11), %s623_s25, 1024, %s628_s2, %s195_s10, %s494_s24, %s494_s24, %s495_s26  }
  0x6b PF: > { %s224_s30 = sand.u32 1, %s476_s6   ;;  %p681_p8 = scmp.ne.s32.totalorder %s678_s19, 0 }
  0x6c   : > { %p682_p10 = scmp.ge.s32.totalorder %s488_s9, 2  ;;  %s225_s17 = scalar_lea.sflag [#allocation4], %s224_s30 }
  0x6e   : > { %p319_p0 = pnand %p682_p10, %p681_p8 }
  0x70   : > { %471 = dma.done.wait (!%p319_p0), %s225_s17, 1024  }
  0x71   : > { %473 = vsyncadd (!%p319_p0), %s225_s17, 4294966272  ;;  %p14_p2 = scmp.ge.s32.totalorder %s531_s12, 4   ;;  %s683_s6 = smov %s480_s7 }
  0x72   : > { %s684_s7 = smov %s484_s8  ;;  %s685_s8 = smov %s543_s15 }
  0x73   : > { %s686_s9 = smov %s531_s12  ;;  %16 = sbr.rel (!%p14_p2) target bundleno = 5 (0x5), region = 69 }
  0x7a   :  { %230 = vsyncpa [#allocation3], 1 }
  0x7b   :  { %232 = vsyncpa [#allocation3 + $0x1], 1 }
  0x7c   :  { %233 = vsyncpa [#allocation4], 1 }
  0x7d   :  { %235 = vsyncpa [#allocation4 + $0x1], 1 }

</bundles_post_ra>
